<compile_context>
chip_gen: v7x
topology: tpu7x:2x2x1
jax: 0.10.0
libtpu: 0.0.40
codegen_flags: <defaults>
</compile_context>

<pallas_src>
import numpy as np
import jax
import jax.numpy as jnp
from jax.experimental import pallas as pl
from jax.experimental.pallas import tpu as pltpu

OUT_W = 128  # lane-dense width of the packed output slab (and of the packed param slab)


# ----------------------------------------------------------------------------------
# Init-time parameter packing (run ONCE, not per forward call).
# ----------------------------------------------------------------------------------
def pack_joined_prior_params(weights, biases, embeddings, out_width=OUT_W):
    """weights: [NL, L, P]; biases: [NL, 1, P]; embeddings: [NL, P, E]  ->  [L+8+out_width, out_width] f32."""
    weights = jnp.asarray(weights, jnp.float32)
    biases = jnp.asarray(biases, jnp.float32)
    embeddings = jnp.asarray(embeddings, jnp.float32)
    NL, L, P = weights.shape
    E = embeddings.shape[-1]
    NLP, NLE = NL * P, NL * E
    assert NLP <= out_width and NLE + NL + 1 <= out_width

    # Region 0 (rows 0..L-1): fused weight matrix; cols l*P:(l+1)*P = layer l weights.
    w_all = jnp.transpose(weights, (1, 0, 2)).reshape(L, NLP)
    w_wide = jnp.zeros((L, out_width), jnp.float32).at[:, :NLP].set(w_all)

    # Region 1 (8 rows, keeps region 2 tile-aligned): row 0 holds the fused bias.
    b_wide = jnp.zeros((8, out_width), jnp.float32).at[0, :NLP].set(biases.reshape(NLP))

    # Region 2 (out_width rows): block-diagonal embedding table.  Row l*P+p carries
    # embeddings[l, p] at cols l*E:(l+1)*E, so onehot @ emb_bd lands every layer's chosen
    # embedding directly at its final output columns.
    emb_bd = jnp.zeros((out_width, out_width), jnp.float32)
    for l in range(NL):
        emb_bd = emb_bd.at[l * P:(l + 1) * P, l * E:(l + 1) * E].set(embeddings[l])

    return jnp.concatenate([w_wide, b_wide, emb_bd], axis=0)


# ----------------------------------------------------------------------------------
# Kernel
# ----------------------------------------------------------------------------------
def _make_joined_prior_kernel(L, NL, P, E, out_w):
    NLE = NL * E
    emb_row0 = L + 8  # first row of the block-diagonal embedding table in the param slab

    def kernel(series_ref, params_ref, out_ref):
        B = series_ref.shape[0]
        series = series_ref[...]                                      # [B, L]    f32

        # All layers' logits with ONE MXU pass (cols >= NL*P stay exactly 0).
        w = params_ref[0:L, :]                                        # [L, out_w]
        b = params_ref[L:L + 1, :]                                    # [1, out_w]
        logits = jnp.dot(series, w,
                         preferred_element_type=jnp.float32) + b      # [B, out_w]

        col = jax.lax.broadcasted_iota(jnp.int32, (B, out_w), 1)      # [B, out_w]

        onehot = jnp.zeros((B, out_w), jnp.float32)
        logprob = jnp.zeros((B, 1), jnp.float32)
        idx_rel = []

        # Static (trace-time) loop over the handful of prior layers; all work is
        # full-width masked VPU ops + lane reductions — no lane slices or concatenates.
        for l in range(NL):
            lo, hi = l * P, (l + 1) * P
            mask = (col >= lo) & (col < hi)                           # segment l lanes

            m = jnp.max(jnp.where(mask, logits, -jnp.inf),
                        axis=1, keepdims=True)                        # [B, 1]
            z = jnp.where(mask, logits - m, -jnp.inf)
            lse = m + jnp.log(jnp.sum(jnp.exp(z), axis=1, keepdims=True))

            # First-occurrence argmax, in absolute column coordinates.
            is_max = mask & (logits == m)
            idx_abs = jnp.min(jnp.where(is_max, col, out_w),
                              axis=1, keepdims=True)                  # [B, 1] i32

            onehot = onehot + jnp.where(col == idx_abs, 1.0, 0.0)     # block-diag one-hot
            idx_rel.append((idx_abs - lo).astype(jnp.float32))        # program index, exact in f32
            # Categorical(logits).log_prob(argmax) == max - logsumexp.
            logprob = logprob + (m - lse)

        # Single block-diagonal one-hot matmul: result already holds the concatenated
        # embeddings at cols [0, NL*E) and zeros elsewhere.
        emb_tab = params_ref[emb_row0:emb_row0 + out_w, :]            # [out_w, out_w]
        out = jnp.dot(onehot, emb_tab,
                      preferred_element_type=jnp.float32)             # [B, out_w]

        # Drop the indices and the summed log-prob into spare lanes via VPU selects.
        for l in range(NL):
            out = jnp.where(col == NLE + l, idx_rel[l], out)
        out = jnp.where(col == NLE + NL, logprob, out)

        # One unmasked lane-dense store, one writeback DMA.
        out_ref[...] = out

    return kernel


# ----------------------------------------------------------------------------------
# Forward builder (packs params once; returns a jitted forward(series))
# ----------------------------------------------------------------------------------
def make_joined_prior_forward(weights, biases, embeddings, out_width=OUT_W):
    NL, L, P = weights.shape
    E = embeddings.shape[-1]
    NLE = NL * E

    packed = pack_joined_prior_params(weights, biases, embeddings, out_width)
    kernel = _make_joined_prior_kernel(L, NL, P, E, out_width)
    n_param_rows = packed.shape[0]
    vmem = pltpu.MemorySpace.VMEM

    @jax.jit
    def _forward(series):
        B = series.shape[0]
        cost = pl.CostEstimate(
            flops=2 * B * L * out_width + 2 * B * out_width * out_width,
            transcendentals=B * out_width * NL,
            bytes_accessed=4 * (B * L + n_param_rows * out_width + B * out_width),
        )
        out = pl.pallas_call(
            kernel,
            out_shape=jax.ShapeDtypeStruct((B, out_width), jnp.float32),
            in_specs=[
                pl.BlockSpec(memory_space=vmem),   # series       [B, L]
                pl.BlockSpec(memory_space=vmem),   # packed params [L+8+out_w, out_w]
            ],
            out_specs=pl.BlockSpec(memory_space=vmem),
            cost_estimate=cost,
        )(series, packed)

        # Split the packed slab back out (tiny per-call slices).
        emb = out[:, :NLE]                                       # [B, NL*E]
        idx = out[:, NLE:NLE + NL].astype(jnp.int32)             # [B, NL]
        logprob = out[:, NLE + NL]                               # [B]
        sampled_program = [idx[:, l] for l in range(NL)]
        return sampled_program, emb, logprob

    def forward(series, program_selection_method="factored_argmax"):
        # TODO(synk): 'sample' selection (Categorical sampling) not implemented in-kernel.
        assert program_selection_method == "factored_argmax"
        return _forward(series)

    return forward


# ----------------------------------------------------------------------------------
# Plain-JAX reference of the PyTorch forward (factored_argmax)
# ----------------------------------------------------------------------------------
def _reference(series, weights, biases, embeddings):
    NL = weights.shape[0]
    idxs, embs = [], []
    logprob = jnp.zeros((series.shape[0],), jnp.float32)
    for l in range(NL):
        logits = series @ weights[l] + biases[l]
        idx = jnp.argmax(logits, axis=1)
        logsm = jax.nn.log_softmax(logits, axis=1)
        logprob = logprob + jnp.take_along_axis(logsm, idx[:, None], axis=1)[:, 0]
        idxs.append(idx.astype(jnp.int32))
        embs.append(embeddings[l][idx])
    return idxs, jnp.concatenate(embs, axis=1), logprob


if __name__ == "__main__":
    # Small shapes consistent with the module:
    #   batch B=2, series_length L=16, num_layers NL=3,
    #   num_programs P=8 per layer, embedding_dim E=5.
    B, L, NL, P, E = 2, 16, 3, 8, 5

    key = jax.random.PRNGKey(0)
    k_w, k_b, k_e, k_s = jax.random.split(key, 4)

    bound = 1.0 / np.sqrt(L)  # nn.Linear default init range
    weights = jax.random.uniform(k_w, (NL, L, P), jnp.float32, -bound, bound)
    biases = jax.random.uniform(k_b, (NL, 1, P), jnp.float32, -bound, bound)
    embeddings = jax.random.normal(k_e, (NL, P, E), jnp.float32)  # nn.Embedding ~ N(0,1)
    series = jax.random.normal(k_s, (B, L), jnp.float32)

    # Init-time packing happens once here; forward() only runs the kernel + tiny splits.
    forward = make_joined_prior_forward(weights, biases, embeddings)
    prog, emb, logp = forward(series, program_selection_method="factored_argmax")
    jax.block_until_ready((prog, emb, logp))

    ref_prog, ref_emb, ref_logp = _reference(series, weights, biases, embeddings)
    for a, b in zip(prog, ref_prog):
        np.testing.assert_array_equal(np.asarray(a), np.asarray(b))
    np.testing.assert_allclose(np.asarray(emb), np.asarray(ref_emb), rtol=1e-5, atol=1e-5)
    np.testing.assert_allclose(np.asarray(logp), np.asarray(ref_logp), rtol=1e-5, atol=1e-5)

    print("KERNEL_OK")
</pallas_src>

<mosaic_0001>
module attributes {stable_mosaic.version = 11 : i64} {
  func.func @kernel(%arg0: memref<2x16xf32, #tpu.memory_space<vmem>>, %arg1: memref<152x128xf32, #tpu.memory_space<vmem>>, %arg2: memref<2x128xf32, #tpu.memory_space<vmem>>) attributes {dimension_semantics = [], scalar_prefetch = 0 : i64, scratch_operands = 0 : i64, tpu.core_type = #tpu.core_type<tc>} {
    %c0 = arith.constant 0 : index
    %c0_0 = arith.constant 0 : index
    %0 = vector.load %arg0[%c0, %c0_0] : memref<2x16xf32, #tpu.memory_space<vmem>>, vector<2x16xf32>
    %c0_1 = arith.constant 0 : index
    %c0_2 = arith.constant 0 : index
    %1 = vector.load %arg1[%c0_1, %c0_2] : memref<152x128xf32, #tpu.memory_space<vmem>>, vector<16x128xf32>
    %c16 = arith.constant 16 : index
    %c0_3 = arith.constant 0 : index
    %2 = vector.load %arg1[%c16, %c0_3] : memref<152x128xf32, #tpu.memory_space<vmem>>, vector<1x128xf32>
    %cst = arith.constant dense<0.000000e+00> : vector<2x128xf32>
    %3 = tpu.matmul %0, %1, %cst {dimension_numbers = #tpu.dot_dimension_numbers<[1], [0], [0], [1], [0, 0, 1, 1], [], []>} : vector<2x16xf32>, vector<16x128xf32>, vector<2x128xf32> -> vector<2x128xf32>
    %4 = vector.broadcast %2 : vector<1x128xf32> to vector<2x128xf32>
    %5 = arith.addf %3, %4 : vector<2x128xf32>
    %6 = tpu.iota {dimensions = array<i32: 1>} : vector<2x128xi32>
    %cst_4 = arith.constant 0.000000e+00 : f32
    %7 = vector.broadcast %cst_4 : f32 to vector<2x128xf32>
    %cst_5 = arith.constant 0.000000e+00 : f32
    %8 = vector.broadcast %cst_5 : f32 to vector<2x1xf32>
    %c0_i32 = arith.constant 0 : i32
    %9 = vector.broadcast %c0_i32 : i32 to vector<2x128xi32>
    %10 = arith.cmpi sge, %6, %9 : vector<2x128xi32>
    %c8_i32 = arith.constant 8 : i32
    %11 = vector.broadcast %c8_i32 : i32 to vector<2x128xi32>
    %12 = arith.cmpi slt, %6, %11 : vector<2x128xi32>
    %13 = arith.andi %10, %12 : vector<2x128xi1>
    %cst_6 = arith.constant 0xFF800000 : f32
    %14 = vector.broadcast %cst_6 : f32 to vector<2x128xf32>
    %15 = arith.select %13, %5, %14 : vector<2x128xi1>, vector<2x128xf32>
    %cst_7 = arith.constant dense<0xFF800000> : vector<2xf32>
    %16 = vector.multi_reduction <maximumf>, %15, %cst_7 [1] : vector<2x128xf32> to vector<2xf32>
    %17 = vector.shape_cast %16 : vector<2xf32> to vector<2x1xf32>
    %18 = vector.broadcast %17 : vector<2x1xf32> to vector<2x128xf32>
    %19 = arith.subf %5, %18 : vector<2x128xf32>
    %cst_8 = arith.constant 0xFF800000 : f32
    %20 = vector.broadcast %cst_8 : f32 to vector<2x128xf32>
    %21 = arith.select %13, %19, %20 : vector<2x128xi1>, vector<2x128xf32>
    %22 = math.exp %21 : vector<2x128xf32>
    %cst_9 = arith.constant dense<0.000000e+00> : vector<2xf32>
    %23 = vector.multi_reduction <add>, %22, %cst_9 [1] : vector<2x128xf32> to vector<2xf32>
    %24 = vector.shape_cast %23 : vector<2xf32> to vector<2x1xf32>
    %25 = math.log %24 : vector<2x1xf32>
    %26 = arith.addf %17, %25 : vector<2x1xf32>
    %27 = vector.broadcast %17 : vector<2x1xf32> to vector<2x128xf32>
    %28 = arith.cmpf oeq, %5, %27 : vector<2x128xf32>
    %29 = arith.andi %13, %28 : vector<2x128xi1>
    %c128_i32 = arith.constant 128 : i32
    %30 = vector.broadcast %c128_i32 : i32 to vector<2x128xi32>
    %31 = arith.select %29, %6, %30 : vector<2x128xi1>, vector<2x128xi32>
    %cst_10 = arith.constant dense<2147483647> : vector<2xi32>
    %32 = vector.multi_reduction <minsi>, %31, %cst_10 [1] : vector<2x128xi32> to vector<2xi32>
    %33 = vector.shape_cast %32 : vector<2xi32> to vector<2x1xi32>
    %34 = vector.broadcast %33 : vector<2x1xi32> to vector<2x128xi32>
    %35 = arith.cmpi eq, %6, %34 : vector<2x128xi32>
    %cst_11 = arith.constant 1.000000e+00 : f32
    %cst_12 = arith.constant 0.000000e+00 : f32
    %36 = vector.broadcast %cst_11 : f32 to vector<2x128xf32>
    %37 = vector.broadcast %cst_12 : f32 to vector<2x128xf32>
    %38 = arith.select %35, %36, %37 : vector<2x128xi1>, vector<2x128xf32>
    %39 = arith.addf %7, %38 : vector<2x128xf32>
    %c0_i32_13 = arith.constant 0 : i32
    %40 = vector.broadcast %c0_i32_13 : i32 to vector<2x1xi32>
    %41 = arith.subi %33, %40 : vector<2x1xi32>
    %42 = arith.sitofp %41 : vector<2x1xi32> to vector<2x1xf32>
    %43 = arith.subf %17, %26 : vector<2x1xf32>
    %44 = arith.addf %8, %43 : vector<2x1xf32>
    %c8_i32_14 = arith.constant 8 : i32
    %45 = vector.broadcast %c8_i32_14 : i32 to vector<2x128xi32>
    %46 = arith.cmpi sge, %6, %45 : vector<2x128xi32>
    %c16_i32 = arith.constant 16 : i32
    %47 = vector.broadcast %c16_i32 : i32 to vector<2x128xi32>
    %48 = arith.cmpi slt, %6, %47 : vector<2x128xi32>
    %49 = arith.andi %46, %48 : vector<2x128xi1>
    %cst_15 = arith.constant 0xFF800000 : f32
    %50 = vector.broadcast %cst_15 : f32 to vector<2x128xf32>
    %51 = arith.select %49, %5, %50 : vector<2x128xi1>, vector<2x128xf32>
    %cst_16 = arith.constant dense<0xFF800000> : vector<2xf32>
    %52 = vector.multi_reduction <maximumf>, %51, %cst_16 [1] : vector<2x128xf32> to vector<2xf32>
    %53 = vector.shape_cast %52 : vector<2xf32> to vector<2x1xf32>
    %54 = vector.broadcast %53 : vector<2x1xf32> to vector<2x128xf32>
    %55 = arith.subf %5, %54 : vector<2x128xf32>
    %cst_17 = arith.constant 0xFF800000 : f32
    %56 = vector.broadcast %cst_17 : f32 to vector<2x128xf32>
    %57 = arith.select %49, %55, %56 : vector<2x128xi1>, vector<2x128xf32>
    %58 = math.exp %57 : vector<2x128xf32>
    %cst_18 = arith.constant dense<0.000000e+00> : vector<2xf32>
    %59 = vector.multi_reduction <add>, %58, %cst_18 [1] : vector<2x128xf32> to vector<2xf32>
    %60 = vector.shape_cast %59 : vector<2xf32> to vector<2x1xf32>
    %61 = math.log %60 : vector<2x1xf32>
    %62 = arith.addf %53, %61 : vector<2x1xf32>
    %63 = vector.broadcast %53 : vector<2x1xf32> to vector<2x128xf32>
    %64 = arith.cmpf oeq, %5, %63 : vector<2x128xf32>
    %65 = arith.andi %49, %64 : vector<2x128xi1>
    %c128_i32_19 = arith.constant 128 : i32
    %66 = vector.broadcast %c128_i32_19 : i32 to vector<2x128xi32>
    %67 = arith.select %65, %6, %66 : vector<2x128xi1>, vector<2x128xi32>
    %cst_20 = arith.constant dense<2147483647> : vector<2xi32>
    %68 = vector.multi_reduction <minsi>, %67, %cst_20 [1] : vector<2x128xi32> to vector<2xi32>
    %69 = vector.shape_cast %68 : vector<2xi32> to vector<2x1xi32>
    %70 = vector.broadcast %69 : vector<2x1xi32> to vector<2x128xi32>
    %71 = arith.cmpi eq, %6, %70 : vector<2x128xi32>
    %cst_21 = arith.constant 1.000000e+00 : f32
    %cst_22 = arith.constant 0.000000e+00 : f32
    %72 = vector.broadcast %cst_21 : f32 to vector<2x128xf32>
    %73 = vector.broadcast %cst_22 : f32 to vector<2x128xf32>
    %74 = arith.select %71, %72, %73 : vector<2x128xi1>, vector<2x128xf32>
    %75 = arith.addf %39, %74 : vector<2x128xf32>
    %c8_i32_23 = arith.constant 8 : i32
    %76 = vector.broadcast %c8_i32_23 : i32 to vector<2x1xi32>
    %77 = arith.subi %69, %76 : vector<2x1xi32>
    %78 = arith.sitofp %77 : vector<2x1xi32> to vector<2x1xf32>
    %79 = arith.subf %53, %62 : vector<2x1xf32>
    %80 = arith.addf %44, %79 : vector<2x1xf32>
    %c16_i32_24 = arith.constant 16 : i32
    %81 = vector.broadcast %c16_i32_24 : i32 to vector<2x128xi32>
    %82 = arith.cmpi sge, %6, %81 : vector<2x128xi32>
    %c24_i32 = arith.constant 24 : i32
    %83 = vector.broadcast %c24_i32 : i32 to vector<2x128xi32>
    %84 = arith.cmpi slt, %6, %83 : vector<2x128xi32>
    %85 = arith.andi %82, %84 : vector<2x128xi1>
    %cst_25 = arith.constant 0xFF800000 : f32
    %86 = vector.broadcast %cst_25 : f32 to vector<2x128xf32>
    %87 = arith.select %85, %5, %86 : vector<2x128xi1>, vector<2x128xf32>
    %cst_26 = arith.constant dense<0xFF800000> : vector<2xf32>
    %88 = vector.multi_reduction <maximumf>, %87, %cst_26 [1] : vector<2x128xf32> to vector<2xf32>
    %89 = vector.shape_cast %88 : vector<2xf32> to vector<2x1xf32>
    %90 = vector.broadcast %89 : vector<2x1xf32> to vector<2x128xf32>
    %91 = arith.subf %5, %90 : vector<2x128xf32>
    %cst_27 = arith.constant 0xFF800000 : f32
    %92 = vector.broadcast %cst_27 : f32 to vector<2x128xf32>
    %93 = arith.select %85, %91, %92 : vector<2x128xi1>, vector<2x128xf32>
    %94 = math.exp %93 : vector<2x128xf32>
    %cst_28 = arith.constant dense<0.000000e+00> : vector<2xf32>
    %95 = vector.multi_reduction <add>, %94, %cst_28 [1] : vector<2x128xf32> to vector<2xf32>
    %96 = vector.shape_cast %95 : vector<2xf32> to vector<2x1xf32>
    %97 = math.log %96 : vector<2x1xf32>
    %98 = arith.addf %89, %97 : vector<2x1xf32>
    %99 = vector.broadcast %89 : vector<2x1xf32> to vector<2x128xf32>
    %100 = arith.cmpf oeq, %5, %99 : vector<2x128xf32>
    %101 = arith.andi %85, %100 : vector<2x128xi1>
    %c128_i32_29 = arith.constant 128 : i32
    %102 = vector.broadcast %c128_i32_29 : i32 to vector<2x128xi32>
    %103 = arith.select %101, %6, %102 : vector<2x128xi1>, vector<2x128xi32>
    %cst_30 = arith.constant dense<2147483647> : vector<2xi32>
    %104 = vector.multi_reduction <minsi>, %103, %cst_30 [1] : vector<2x128xi32> to vector<2xi32>
    %105 = vector.shape_cast %104 : vector<2xi32> to vector<2x1xi32>
    %106 = vector.broadcast %105 : vector<2x1xi32> to vector<2x128xi32>
    %107 = arith.cmpi eq, %6, %106 : vector<2x128xi32>
    %cst_31 = arith.constant 1.000000e+00 : f32
    %cst_32 = arith.constant 0.000000e+00 : f32
    %108 = vector.broadcast %cst_31 : f32 to vector<2x128xf32>
    %109 = vector.broadcast %cst_32 : f32 to vector<2x128xf32>
    %110 = arith.select %107, %108, %109 : vector<2x128xi1>, vector<2x128xf32>
    %111 = arith.addf %75, %110 : vector<2x128xf32>
    %c16_i32_33 = arith.constant 16 : i32
    %112 = vector.broadcast %c16_i32_33 : i32 to vector<2x1xi32>
    %113 = arith.subi %105, %112 : vector<2x1xi32>
    %114 = arith.sitofp %113 : vector<2x1xi32> to vector<2x1xf32>
    %115 = arith.subf %89, %98 : vector<2x1xf32>
    %116 = arith.addf %80, %115 : vector<2x1xf32>
    %c24 = arith.constant 24 : index
    %c0_34 = arith.constant 0 : index
    %117 = vector.load %arg1[%c24, %c0_34] : memref<152x128xf32, #tpu.memory_space<vmem>>, vector<128x128xf32>
    %cst_35 = arith.constant dense<0.000000e+00> : vector<2x128xf32>
    %118 = tpu.matmul %111, %117, %cst_35 {dimension_numbers = #tpu.dot_dimension_numbers<[1], [0], [0], [1], [0, 0, 1, 1], [], []>} : vector<2x128xf32>, vector<128x128xf32>, vector<2x128xf32> -> vector<2x128xf32>
    %c15_i32 = arith.constant 15 : i32
    %119 = vector.broadcast %c15_i32 : i32 to vector<2x128xi32>
    %120 = arith.cmpi eq, %6, %119 : vector<2x128xi32>
    %121 = vector.shape_cast %42 : vector<2x1xf32> to vector<2x1xf32>
    %122 = vector.broadcast %121 : vector<2x1xf32> to vector<2x128xf32>
    %123 = arith.select %120, %122, %118 : vector<2x128xi1>, vector<2x128xf32>
    %c16_i32_36 = arith.constant 16 : i32
    %124 = vector.broadcast %c16_i32_36 : i32 to vector<2x128xi32>
    %125 = arith.cmpi eq, %6, %124 : vector<2x128xi32>
    %126 = vector.shape_cast %78 : vector<2x1xf32> to vector<2x1xf32>
    %127 = vector.broadcast %126 : vector<2x1xf32> to vector<2x128xf32>
    %128 = arith.select %125, %127, %123 : vector<2x128xi1>, vector<2x128xf32>
    %c17_i32 = arith.constant 17 : i32
    %129 = vector.broadcast %c17_i32 : i32 to vector<2x128xi32>
    %130 = arith.cmpi eq, %6, %129 : vector<2x128xi32>
    %131 = vector.shape_cast %114 : vector<2x1xf32> to vector<2x1xf32>
    %132 = vector.broadcast %131 : vector<2x1xf32> to vector<2x128xf32>
    %133 = arith.select %130, %132, %128 : vector<2x128xi1>, vector<2x128xf32>
    %c18_i32 = arith.constant 18 : i32
    %134 = vector.broadcast %c18_i32 : i32 to vector<2x128xi32>
    %135 = arith.cmpi eq, %6, %134 : vector<2x128xi32>
    %136 = vector.shape_cast %116 : vector<2x1xf32> to vector<2x1xf32>
    %137 = vector.broadcast %136 : vector<2x1xf32> to vector<2x128xf32>
    %138 = arith.select %135, %137, %133 : vector<2x128xi1>, vector<2x128xf32>
    %c0_37 = arith.constant 0 : index
    %c0_38 = arith.constant 0 : index
    %139 = vector.load %arg2[%c0_37, %c0_38] : memref<2x128xf32, #tpu.memory_space<vmem>>, vector<2x128xf32>
    tpu.vector_store %arg2[%c0_37, %c0_38], %138 {strides = array<i32>} : memref<2x128xf32, #tpu.memory_space<vmem>>, vector<2x128xf32>,
    return
  }
}

</mosaic_0001>

<bundles_post_ra>
// kernel: _forward.1
= control target key start
LH: loop header
LB: loop body
LE: loop exit
PB: predicated region body
PF: predicated region fallthrough
CT: control target
= control target key end

     0   :  { %7 = vsyncpa [#allocation3], 0  ;;  %s659_s0 = inlined_call_operand.hbm [shape: f32[2,16], index: 0, kind: input, shape index: {}]   ;;  %s660_s1 = inlined_call_operand.hbm [shape: f32[152,128], index: 1, kind: input, shape index: {}]   ;;  %s661_s2 = inlined_call_operand.vmem [shape: f32[2,128], index: 2, kind: output, shape index: {}]  }
   0x1   :  { %8 = vsyncpa [#allocation5], 0  ;;  %s508_s9 = smov [#allocation2]   ;;  %s509_s11 = smov [#allocation4]  }
   0x2   :  { %s15_s10 = sshll.u32 %s508_s9, 4  ;;  %s24_s12 = sshll.u32 %s509_s11, 4  ;;  %s16_s10 = int_to_ptr.vmem [resolvable:$true] %s15_s10  ;;  %s530_s12 = int_to_ptr.vmem [resolvable:$true] %s24_s12 }
   0x3   :  { %s460_s15 = scalar_lea.hbm %s659_s0, 32 }
   0x4   :  { %p461_p0 = scmp.ne.s32.totalorder %s659_s0, %s460_s15  ;;  %p464_p1 = scmp.lt.u32.totalorder %s460_s15, %s659_s0 }
   0x6   :  { %p466_p2 = pnand %p464_p1, %p461_p0 }
   0x8   :  { %469 = shalt.err (!%p466_p2)
}
   0x9   :  { %s470_s20 = scalar_lea.vmem %s16_s10, 32  ;;  %p475_p4 = scmp.lt.s32.totalorder %s16_s10, %s16_s10 }
   0xa   :  { %p471_p3 = scmp.ne.s32.totalorder %s16_s10, %s470_s20  ;;  %p476_p5 = scmp.lt.s32.totalorder %s470_s20, %s470_s20 }
   0xc   :  { %p477_p6 = por %p476_p5, %p475_p4 }
   0xe   :  { %p478_p7 = pnand %p477_p6, %p471_p3 }
  0x10   :  { %481 = shalt.err (!%p478_p7)
}
  0x11   :  { %18 = dma.hbm_to_vmem [thread:$0]  %s659_s0, 32, %s16_s10, [#allocation3]  }
  0x12   :  { %s482_s25 = scalar_lea.hbm %s660_s1, 2432 }
  0x13   :  { %p483_p8 = scmp.ne.s32.totalorder %s660_s1, %s482_s25  ;;  %p486_p9 = scmp.lt.u32.totalorder %s482_s25, %s660_s1 }
  0x15   :  { %p488_p10 = pnand %p486_p9, %p483_p8 }
  0x17   :  { %491 = shalt.err (!%p488_p10)
}
  0x18   :  { %s492_s30 = scalar_lea.vmem %s530_s12, 2432  ;;  %p497_p12 = scmp.lt.s32.totalorder %s530_s12, %s530_s12 }
  0x19   :  { %p493_p11 = scmp.ne.s32.totalorder %s530_s12, %s492_s30  ;;  %p498_p13 = scmp.lt.s32.totalorder %s492_s30, %s492_s30 }
  0x1b   :  { %p499_p0 = por %p498_p13, %p497_p12 }
  0x1d   :  { %p500_p1 = pnand %p499_p0, %p493_p11 }
  0x1f   :  { %503 = shalt.err (!%p500_p1)
}
  0x20   :  { %s510_s0 = smov 128   ;;  %s511_s3 = smov 8  }
  0x21   :  { %30 = dma.hbm_to_vmem [thread:$0]  %s660_s1, 2432, %s530_s12, [#allocation5], %s510_s0, %s510_s0, %s511_s3  }
  0x22   :  { %504 = dma.done.wait [#allocation3], 32  }
  0x23   :  { %505 = vsyncadd [#allocation3], 4294967264 }
  0x24   :  { %506 = dma.done.wait [#allocation5], 2432  }
  0x25   :  { %507 = vsyncadd [#allocation5], 4294964864  ;;  %v512_v0 = vmov 0.0|0.0   ;;  %vm513_vm0 = vmmov 0   ;;  %v514_v1 = vmov 0.0   ;;  %v38_v2 = vld [vmem:[#allocation4] sm:$0xff]  ;;  %v119_v6 = vlaneseq }
  0x26   :  { %414 = vmatprep.subr.bf16.mxu0 %v512_v0  ;;  %376 = vmatprep.mubr.msk.f32.mxu0 %vm513_vm0, %v514_v1  ;;  %v39_v3 = vld [vmem:[#allocation4 + $0x8] sm:$0xff]  ;;  %v37_v5 = vld [vmem:[#allocation2] sm:$0x3]  ;;  %vm45_vm1 = vcmask 130048   ;;  %v348_v8 = vld [vmem:[#allocation4 + $0x10] ss:$0 sm:$0xff] }
  0x27   :  { %417 = vmatprep.subr.bf16.mxu1 %v512_v0  ;;  %411 = vmatprep.mubr.msk.f32.mxu1 %vm513_vm0, %v514_v1  ;;  %v415_v4 = vpack.c.bf16 %v39_v3, %v38_v2  ;;  %v565_v7 = vand.u32 127, %v119_v6  ;;  %vm125_vm8 = vcmask 1041408   ;;  %v247_v35 = vld [vmem:[#allocation4 + $0x18] sm:$0xff]  ;;  %v248_v36 = vld [vmem:[#allocation4 + $0x20] sm:$0xff]  ;;  %v249_v37 = vld [vmem:[#allocation4 + $0x28] sm:$0xff] }
  0x28   :  { %v418_v38 = vpack.c.bf16 %v248_v36, %v247_v35  ;;  %v250_v39 = vld [vmem:[#allocation4 + $0x30] sm:$0xff]  ;;  %v251_v41 = vld [vmem:[#allocation4 + $0x38] sm:$0xff]  ;;  %v252_v42 = vld [vmem:[#allocation4 + $0x40] sm:$0xff] }
  0x29   :  { %416 = vmatpush3.bf16.msra.mxu0 %v415_v4  ;;  %vm205_vm2 = vcmp.ge.s32.totalorder %v565_v7, 16  ;;  %vm206_vm3 = vcmp.lt.s32.totalorder %v565_v7, 24  ;;  %vm163_vm4 = vcmp.ge.s32.totalorder %v565_v7, 8  ;;  %vm164_vm5 = vcmp.lt.s32.totalorder %v565_v7, 16  ;;  %v253_v44 = vld [vmem:[#allocation4 + $0x48] sm:$0xff]  ;;  %v254_v45 = vld [vmem:[#allocation4 + $0x50] sm:$0xff] }
  0x2a   :  { %vm571_vm6 = vmand %vm205_vm2, %vm206_vm3  ;;  %vm122_vm7 = vcmp.lt.s32.totalorder %v565_v7, 8  ;;  %419 = vmatpush3.bf16.msra.mxu1 %v418_v38  ;;  %v421_v40 = vpack.c.bf16 %v250_v39, %v249_v37  ;;  %v424_v43 = vpack.c.bf16 %v252_v42, %v251_v41  ;;  %v427_v46 = vpack.c.bf16 %v254_v45, %v253_v44  ;;  %v255_v47 = vld [vmem:[#allocation4 + $0x58] sm:$0xff]  ;;  %v256_v48 = vld [vmem:[#allocation4 + $0x60] sm:$0xff] }
  0x2b   :  { %vm578_vm9 = vmand %vm163_vm4, %vm164_vm5  ;;  %420 = vmatprep.subr.bf16.mxu1 %v512_v0  ;;  %v430_v49 = vpack.c.bf16 %v256_v48, %v255_v47 }
  0x2c   :  { %377 = vmatmul.mubr.msk.f32.vlgmr.msra.gmra.mrb[0].mxu0 %vm45_vm1, %v37_v5 }
  0x2e   :  { %422 = vmatpush3.bf16.msra.mxu1 %v421_v40 }
  0x2f   :  { %423 = vmatprep.subr.bf16.mxu1 %v512_v0 }
  0x32   :  { %425 = vmatpush3.bf16.msra.mxu1 %v424_v43 }
  0x33   :  { %426 = vmatprep.subr.bf16.mxu1 %v512_v0 }
  0x36   :  { %428 = vmatpush3.bf16.msra.mxu1 %v427_v46 }
  0x37   :  { %429 = vmatprep.subr.bf16.mxu1 %v512_v0 }
  0x3a   :  { %431 = vmatpush3.bf16.msra.mxu1 %v430_v49 }
  0x3b   :  { %432 = vmatprep.subr.bf16.mxu1 %v512_v0 }
  0xff   :  { %v115_v9 = vpop.f32.mrb[0].mxu0 }
 0x100   :  { %v576_v11 = vadd.f32 %v348_v8, %v115_v9  ;;  %v378_v12 = vpop.f32.mrb[1].mxu0 }
 0x102   :  { %v208_v14 = vsel %vm571_vm6, %v576_v11, -inf  ;;  %v124_v15 = vsel %vm122_vm7, %v576_v11, -inf  ;;  %v166_v18 = vsel %vm578_vm9, %v576_v11, -inf }
 0x103   :  { %v209_v16 = vsel %vm125_vm8, %v208_v14, -inf  ;;  %v126_v17 = vsel %vm125_vm8, %v124_v15, -inf  ;;  %v167_v19 = vsel %vm125_vm8, %v166_v18, -inf }
 0x104   :  { %210 = vmax.xlane.f32.xlu1 %v209_v16  ;;  %127 = vmax.xlane.f32.xlu0 %v126_v17  ;;  %v257_v16 = vld [vmem:[#allocation4 + $0x68] sm:$0xff]  ;;  %v258_v17 = vld [vmem:[#allocation4 + $0x70] sm:$0xff] }
 0x105   :  { %v433_v18 = vpack.c.bf16 %v258_v17, %v257_v16 }
 0x107   :  { %434 = vmatpush3.bf16.msra.mxu1 %v433_v18 }
 0x108   :  { %168 = vmax.xlane.f32.xlu0 %v167_v19  ;;  %435 = vmatprep.subr.bf16.mxu1 %v512_v0  ;;  %v259_v19 = vld [vmem:[#allocation4 + $0x78] sm:$0xff] }
 0x191   :  { %v594_v20 = vpop.xlane.xlu1 %210  ;;  %v596_v21 = vpop.xlane.xlu0 %127 }
 0x192   :  { %vm222_vm10 = vcmp.eq.f32.partialorder %v576_v11, %v594_v20  ;;  %vm139_vm11 = vcmp.eq.f32.partialorder %v576_v11, %v596_v21  ;;  %v129_v51 = vsub.f32 %v576_v11, %v596_v21  ;;  %v212_v53 = vsub.f32 %v576_v11, %v594_v20 }
 0x193   :  { %vm140_vm12 = vmand %vm122_vm7, %vm139_vm11 }
 0x194   :  { %v141_v22 = vsel %vm140_vm12, %v565_v7, 128  ;;  %vm223_vm13 = vmand %vm571_vm6, %vm222_vm10  ;;  %v130_v54 = vsel %vm122_vm7, %v129_v51, -inf  ;;  %v213_v57 = vsel %vm571_vm6, %v212_v53, -inf  ;;  %vm333_vm6 = vcmp.eq.s32.totalorder %v565_v7, 15 }
 0x195   :  { %v607_v23 = vpop.xlane.xlu0 %168  ;;  %v142_v24 = vsel %vm125_vm8, %v141_v22, 2147483647  ;;  %v224_v26 = vsel %vm223_vm13, %v565_v7, 128  ;;  %v131_v56 = vmul.f32 1.442695, %v130_v54  ;;  %v260_v22 = vld [vmem:[#allocation4 + $0x80] sm:$0xff] }
 0x196   :  { %vm180_vm14 = vcmp.eq.f32.partialorder %v576_v11, %v607_v23  ;;  %v144_v25 = vshra.s32 %v142_v24, 16  ;;  %v225_v27 = vsel %vm125_vm8, %v224_v26, 2147483647  ;;  %v170_v50 = vsub.f32 %v576_v11, %v607_v23  ;;  %v262_v26 = vld [vmem:[#allocation4 + $0x90] sm:$0xff] }
 0x197   :  { %vm181_vm15 = vmand %vm578_vm9, %vm180_vm14  ;;  %v227_v29 = vshra.s32 %v225_v27, 16  ;;  %v143_v58 = vand.u32 65535, %v142_v24  ;;  %v214_v59 = vmul.f32 1.442695, %v213_v57  ;;  %v226_v62 = vand.u32 65535, %v225_v27 }
 0x198   :  { %v146_v28 = vcvt.s32.f32 %v144_v25  ;;  %v182_v30 = vsel %vm181_vm15, %v565_v7, 128  ;;  %v171_v52 = vsel %vm578_vm9, %v170_v50, -inf  ;;  %v436_v24 = vpack.c.bf16 %v260_v22, %v259_v19  ;;  %v261_v25 = vld [vmem:[#allocation4 + $0x88] sm:$0xff] }
 0x199   :  { %v183_v31 = vsel %vm125_vm8, %v182_v30, 2147483647  ;;  %v229_v33 = vcvt.s32.f32 %v227_v29  ;;  %v172_v55 = vmul.f32 1.442695, %v171_v52  ;;  %v145_v61 = vcvt.s32.f32 %v143_v58 }
 0x19a   :  { %147 = vmin.xlane.f32.xlu1 %v146_v28  ;;  %v185_v32 = vshra.s32 %v183_v31, 16  ;;  %v184_v63 = vand.u32 65535, %v183_v31  ;;  %v228_v4 = vcvt.s32.f32 %v226_v62  ;;  %437 = vmatpush3.bf16.msra.mxu1 %v436_v24  ;;  %v439_v27 = vpack.c.bf16 %v262_v26, %v261_v25 }
 0x19b   :  { %448 = vpow2.f32 %v172_v55  ;;  %438 = vmatprep.subr.bf16.mxu1 %v512_v0  ;;  %vm335_vm7 = vcmp.eq.s32.totalorder %v565_v7, 16  ;;  %vm339_vm9 = vcmp.eq.s32.totalorder %v565_v7, 18 }
 0x19c   :  { %v187_v34 = vcvt.s32.f32 %v185_v32  ;;  %450 = vpow2.f32 %v131_v56  ;;  %v186_v6 = vcvt.s32.f32 %v184_v63 }
 0x19d   :  { %452 = vpow2.f32 %v214_v59 }
 0x19e   :  { %230 = vmin.xlane.f32.xlu1 %v229_v33  ;;  %188 = vmin.xlane.f32.xlu0 %v187_v34 }
 0x19f   :  { %440 = vmatpush3.bf16.msra.mxu1 %v439_v27 }
 0x1a5   :  { %v449_v9 = vpop.eup %448 }
 0x1a6   :  { %v451_v11 = vpop.eup %450  ;;  %v174_v12 = vsel %vm125_vm8, %v449_v9, 0.0 }
 0x1a7   :  { %v133_v13 = vsel %vm125_vm8, %v451_v11, 0.0  ;;  %v453_v14 = vpop.eup %452 }
 0x1a8   :  { %v216_v15 = vsel %vm125_vm8, %v453_v14, 0.0  ;;  %vm337_vm8 = vcmp.eq.s32.totalorder %v565_v7, 17 }
 0x227   :  { %v148_v60 = vpop.xlane.xlu1 %147 }
 0x228   :  { %vm149_vm0 = vcmp.eq.f32.partialorder %v146_v28, %v148_v60  ;;  %v154_v28 = vcvt.f32.s32 %v148_v60 }
 0x229   :  { %v150_v2 = vsel %vm149_vm0, %v145_v61, inf }
 0x22a   :  { %151 = vmin.xlane.f32.xlu0 %v150_v2  ;;  %v155_v32 = vshll.u32 %v154_v28, 16 }
 0x22b   :  { %v231_v3 = vpop.xlane.xlu1 %230  ;;  %v189_v5 = vpop.xlane.xlu0 %188 }
 0x22c   :  { %vm232_vm1 = vcmp.eq.f32.partialorder %v229_v33, %v231_v3  ;;  %vm190_vm2 = vcmp.eq.f32.partialorder %v187_v34, %v189_v5  ;;  %v237_v30 = vcvt.f32.s32 %v231_v3  ;;  %v195_v33 = vcvt.f32.s32 %v189_v5 }
 0x22d   :  { %v233_v8 = vsel %vm232_vm1, %v228_v4, inf  ;;  %v191_v10 = vsel %vm190_vm2, %v186_v6, inf }
 0x22e   :  { %234 = vmin.xlane.f32.xlu0 %v233_v8  ;;  %192 = vmin.xlane.f32.xlu1 %v191_v10  ;;  %v238_v36 = vshll.u32 %v237_v30, 16  ;;  %v196_v39 = vshll.u32 %v195_v33, 16 }
 0x232   :  { %175 = vadd.xlane.f32.xlu0 %v174_v12  ;;  %134 = vadd.xlane.f32.xlu1 %v133_v13 }
 0x236   :  { %217 = vadd.xlane.f32.xlu1 %v216_v15 }
 0x2b7   :  { %v152_v29 = vpop.xlane.xlu0 %151 }
 0x2b8   :  { %v153_v31 = vcvt.f32.s32 %v152_v29 }
 0x2ba   :  { %v156_v34 = vadd.s32 %v155_v32, %v153_v31 }
 0x2bb   :  { %v235_v35 = vpop.xlane.xlu0 %234  ;;  %v193_v38 = vpop.xlane.xlu1 %192 }
 0x2bc   :  { %v236_v37 = vcvt.f32.s32 %v235_v35  ;;  %v194_v40 = vcvt.f32.s32 %v193_v38  ;;  %vm157_vm3 = vcmp.eq.s32.totalorder %v565_v7, %v156_v34  ;;  %v160_v63 = vcvt.s32.f32 %v156_v34 }
 0x2bd   :  { %v158_v42 = vsel %vm157_vm3, 1.0, %v514_v1 }
 0x2be   :  { %v239_v41 = vadd.s32 %v238_v36, %v236_v37  ;;  %v197_v0 = vadd.s32 %v196_v39, %v194_v40 }
 0x2bf   :  { %v135_v47 = vpop.xlane.xlu1 %134  ;;  %v176_v48 = vpop.xlane.xlu0 %175 }
 0x2c0   :  { %vm240_vm4 = vcmp.eq.s32.totalorder %v565_v7, %v239_v41  ;;  %vm198_vm5 = vcmp.eq.s32.totalorder %v565_v7, %v197_v0  ;;  %454 = vlog2.f32 %v176_v48  ;;  %v350_v58 = vadd.s32 4294967288, %v197_v0 }
 0x2c1   :  { %v199_v43 = vsel %vm198_vm5, 1.0, %v514_v1  ;;  %v241_v45 = vsel %vm240_vm4, 1.0, %v514_v1  ;;  %456 = vlog2.f32 %v135_v47  ;;  %v351_v61 = vadd.s32 4294967280, %v239_v41 }
 0x2c2   :  { %v200_v44 = vadd.f32 %v199_v43, %v158_v42  ;;  %v202_v2 = vcvt.s32.f32 %v350_v58 }
 0x2c3   :  { %v218_v49 = vpop.xlane.xlu1 %217  ;;  %v244_v5 = vcvt.s32.f32 %v351_v61 }
 0x2c4   :  { %v242_v46 = vadd.f32 %v241_v45, %v200_v44  ;;  %458 = vlog2.f32 %v218_v49 }
 0x2c6   :  { %412 = vmatmul.mubr.f32.vlgmr.msra.gmra.mrb[0].mxu1 %v242_v46 }
 0x2ca   :  { %v455_v50 = vpop.eup %454 }
 0x2cb   :  { %v457_v51 = vpop.eup %456  ;;  %v178_v54 = vmul.f32 0.6931472, %v455_v50 }
 0x2cc   :  { %v137_v53 = vmul.f32 0.6931472, %v457_v51 }
 0x2cd   :  { %v179_v57 = vadd.f32 %v178_v54, %v607_v23 }
 0x2ce   :  { %v459_v52 = vpop.eup %458  ;;  %v138_v56 = vadd.f32 %v137_v53, %v596_v21 }
 0x2cf   :  { %v220_v55 = vmul.f32 0.6931472, %v459_v52  ;;  %v203_v60 = vsub.f32 %v607_v23, %v179_v57 }
 0x2d0   :  { %v161_v59 = vsub.f32 %v596_v21, %v138_v56 }
 0x2d1   :  { %v221_v1 = vadd.f32 %v220_v55, %v594_v20 }
 0x2d2   :  { %v204_v3 = vadd.f32 %v203_v60, %v161_v59 }
 0x2d3   :  { %v245_v62 = vsub.f32 %v594_v20, %v221_v1 }
 0x2d5   :  { %v246_v8 = vadd.f32 %v245_v62, %v204_v3 }
 0x399   :  { %v329_v4 = vpop.f32.mrb[0].mxu1 }
 0x39a   :  { %v334_v6 = vsel %vm333_vm6, %v160_v63, %v329_v4  ;;  %v413_v21 = vpop.f32.mrb[1].mxu1 }
 0x39b   :  { %v336_v23 = vsel %vm335_vm7, %v202_v2, %v334_v6 }
 0x39c   :  { %v338_v9 = vsel %vm337_vm8, %v244_v5, %v336_v23 }
 0x39d   :  { %v340_v10 = vsel %vm339_vm9, %v246_v8, %v338_v9 }
 0x39e   :  { %341 = vst [vmem:[%s661_s2] sm:$0x3] %v340_v10 }
 0x39f   :  { %346 = vsyncpa [#allocation3], 1 }
 0x3a0   :  { %347 = vsyncpa [#allocation5], 1 }

</bundles_post_ra>
